<compile_context>
chip_gen: v5e
topology: v5e:2x2
jax: 0.10.0
libtpu: 0.0.40
codegen_flags: <defaults>
</compile_context>

<pallas_src>
import math

import jax
import jax.numpy as jnp
from jax.experimental import pallas as pl
from jax.experimental.pallas import tpu as pltpu


def _softmax_lastdim(x):
    m = jnp.max(x, axis=-1, keepdims=True)
    e = jnp.exp(x - m)
    # Exact normalization (correctness: approx reciprocal gave ~2e-3 error).
    return e / jnp.sum(e, axis=-1, keepdims=True)


def _cma_kernel(
    f1_ref, f2_ref,           # (Bt, S1, D1), (Bt, S2, D2)
    w1_ref, b1_ref,           # (D1, 3A), (1, 3A)   [q*inv_scale | k | v] for modality 1
    w2_ref, b2_ref,           # (D2, 3A), (1, 3A)   [q*inv_scale | k | v] for modality 2
    f12_ref, f21_ref, a12_ref, a21_ref,
):
    bt, s1, d1 = f1_ref.shape
    _, s2, d2 = f2_ref.shape
    a = w1_ref.shape[1] // 3

    f1 = f1_ref[...].astype(jnp.float32)
    f2 = f2_ref[...].astype(jnp.float32)

    # Fused QKV: one (Bt*S, D) @ (D, 3A) MXU matmul per modality (6 projections -> 2).
    p1 = jnp.dot(f1.reshape(bt * s1, d1), w1_ref[...],
                 preferred_element_type=jnp.float32) + b1_ref[...]
    p2 = jnp.dot(f2.reshape(bt * s2, d2), w2_ref[...],
                 preferred_element_type=jnp.float32) + b2_ref[...]
    p1 = p1.reshape(bt, s1, 3 * a)
    p2 = p2.reshape(bt, s2, 3 * a)

    q1 = p1[:, :, 0 * a:1 * a]   # already scaled by 1/sqrt(A) (folded on host)
    k1 = p1[:, :, 1 * a:2 * a]
    v1 = p1[:, :, 2 * a:3 * a]
    q2 = p2[:, :, 0 * a:1 * a]   # already scaled by 1/sqrt(A) (folded on host)
    k2 = p2[:, :, 1 * a:2 * a]
    v2 = p2[:, :, 2 * a:3 * a]

    # ---- direction 1 -> 2 : contract feature dims directly (no K transpose copy) ----
    s12 = jnp.einsum("bqd,bkd->bqk", q1, k2, preferred_element_type=jnp.float32)
    attn_12 = _softmax_lastdim(s12)                                  # (Bt, S1, S2)
    f1_to_2 = jnp.einsum("bqk,bkd->bqd", attn_12, v2,
                         preferred_element_type=jnp.float32)         # (Bt, S1, A)

    # ---- direction 2 -> 1 ----
    s21 = jnp.einsum("bqd,bkd->bqk", q2, k1, preferred_element_type=jnp.float32)
    attn_21 = _softmax_lastdim(s21)                                  # (Bt, S2, S1)
    f2_to_1 = jnp.einsum("bqk,bkd->bqd", attn_21, v1,
                         preferred_element_type=jnp.float32)         # (Bt, S2, A)

    f12_ref[...] = f1_to_2.astype(f12_ref.dtype)
    f21_ref[...] = f2_to_1.astype(f21_ref.dtype)
    a12_ref[...] = attn_12.astype(a12_ref.dtype)
    a21_ref[...] = attn_21.astype(a21_ref.dtype)


def _pick_block_b(B, S1, S2, D1, D2, A):
    """Choose how many batch elements to process per grid step."""
    rows = max(S1, S2, 1)
    bt = max(1, 128 // rows)                         # target ~128 rows into the MXU
    # Conservative per-step VMEM budget (f32, double-buffered in/out blocks);
    # 8 MiB leaves ample headroom even on v7x (64 MiB VMEM, 32 MiB scoped default).
    per_b = 4 * (S1 * D1 + S2 * D2 + S1 * A + S2 * A + 2 * S1 * S2)
    bt = min(bt, max(1, (8 * 1024 * 1024) // (2 * per_b)))
    bt = min(bt, B)
    if bt >= B and B > 1:
        bt = max(1, B // 2)                          # keep >=2 grid steps (v7x: 2 TCs)
    while B % bt:                                    # full blocks only
        bt -= 1
    return bt


def cross_modal_attention(feat1, feat2, params, attention_dim, block_b=None):
    """feat1: (B, S1, D1); feat2: (B, S2, D2). Returns (F1_to_2, F2_to_1, A12, A21)."""
    B, S1, D1 = feat1.shape
    B2, S2, D2 = feat2.shape
    assert B == B2
    A = attention_dim

    (wq1, bq1, wk2, bk2, wv2, bv2, wq2, bq2, wk1, bk1, wv1, bv1) = params

    # Fold the 1/sqrt(A) score scale into the query projections (one-time host op)
    # and fuse each modality's Q/K/V projections into a single (D, 3A) matmul.
    inv_scale = jnp.float32(1.0 / math.sqrt(A))
    w1 = jnp.concatenate([wq1 * inv_scale, wk1, wv1], axis=1)   # (D1, 3A)
    b1 = jnp.concatenate([bq1 * inv_scale, bk1, bv1], axis=1)   # (1, 3A)
    w2 = jnp.concatenate([wq2 * inv_scale, wk2, wv2], axis=1)   # (D2, 3A)
    b2 = jnp.concatenate([bq2 * inv_scale, bk2, bv2], axis=1)   # (1, 3A)

    bt = block_b if block_b is not None else _pick_block_b(B, S1, S2, D1, D2, A)
    grid = (B // bt,)

    def batched(shape):
        return pl.BlockSpec((bt,) + shape, lambda b: (b, 0, 0))

    def full2d(shape):
        return pl.BlockSpec(shape, lambda b: (0, 0))

    in_specs = [
        batched((S1, D1)),                  # feat1
        batched((S2, D2)),                  # feat2
        full2d((D1, 3 * A)), full2d((1, 3 * A)),   # fused w1, b1
        full2d((D2, 3 * A)), full2d((1, 3 * A)),   # fused w2, b2
    ]
    out_specs = [
        batched((S1, A)),                   # F1_to_2
        batched((S2, A)),                   # F2_to_1
        batched((S1, S2)),                  # attention weights 1->2
        batched((S2, S1)),                  # attention weights 2->1
    ]
    out_shape = [
        jax.ShapeDtypeStruct((B, S1, A), jnp.float32),
        jax.ShapeDtypeStruct((B, S2, A), jnp.float32),
        jax.ShapeDtypeStruct((B, S1, S2), jnp.float32),
        jax.ShapeDtypeStruct((B, S2, S1), jnp.float32),
    ]

    return pl.pallas_call(
        _cma_kernel,
        out_shape=out_shape,
        grid_spec=pltpu.PrefetchScalarGridSpec(
            num_scalar_prefetch=0,
            grid=grid,
            in_specs=in_specs,
            out_specs=out_specs,
        ),
        compiler_params=pltpu.CompilerParams(
            dimension_semantics=("parallel",),
        ),
    )(feat1, feat2, w1, b1, w2, b2)


def init_linear(key, in_dim, out_dim):
    """Deterministic PyTorch-nn.Linear-style init. Returns (W^T, bias_row)."""
    kw, kb = jax.random.split(key)
    bound = 1.0 / math.sqrt(in_dim)
    # PyTorch weight is (out, in); we store the transpose (in, out) for x @ W.
    w_t = jax.random.uniform(kw, (in_dim, out_dim), jnp.float32, -bound, bound)
    b = jax.random.uniform(kb, (1, out_dim), jnp.float32, -bound, bound)
    return w_t, b


def reference_jax(feat1, feat2, params, attention_dim):
    (wq1, bq1, wk2, bk2, wv2, bv2, wq2, bq2, wk1, bk1, wv1, bv1) = params
    scale = math.sqrt(attention_dim)
    Q1 = feat1 @ wq1 + bq1
    K2 = feat2 @ wk2 + bk2
    V2 = feat2 @ wv2 + bv2
    s12 = jnp.einsum("bik,bjk->bij", Q1, K2) / scale
    a12 = jax.nn.softmax(s12, axis=-1)
    F12 = jnp.einsum("bij,bjk->bik", a12, V2)
    Q2 = feat2 @ wq2 + bq2
    K1 = feat1 @ wk1 + bk1
    V1 = feat1 @ wv1 + bv1
    s21 = jnp.einsum("bik,bjk->bij", Q2, K1) / scale
    a21 = jax.nn.softmax(s21, axis=-1)
    F21 = jnp.einsum("bij,bjk->bik", a21, V1)
    return F12, F21, a12, a21


if __name__ == "__main__":
    B, S1, S2 = 2, 8, 8
    DIM1, DIM2, ATT = 16, 32, 32

    root = jax.random.PRNGKey(0)
    keys = jax.random.split(root, 8)

    feat1 = jax.random.normal(keys[0], (B, S1, DIM1), jnp.float32)
    feat2 = jax.random.normal(keys[1], (B, S2, DIM2), jnp.float32)

    wq1, bq1 = init_linear(keys[2], DIM1, ATT)
    wk2, bk2 = init_linear(keys[3], DIM2, ATT)
    wv2, bv2 = init_linear(keys[4], DIM2, ATT)
    wq2, bq2 = init_linear(keys[5], DIM2, ATT)
    wk1, bk1 = init_linear(keys[6], DIM1, ATT)
    wv1, bv1 = init_linear(keys[7], DIM1, ATT)

    params = (wq1, bq1, wk2, bk2, wv2, bv2, wq2, bq2, wk1, bk1, wv1, bv1)

    outs = cross_modal_attention(feat1, feat2, params, ATT)
    outs = jax.block_until_ready(outs)

    refs = reference_jax(feat1, feat2, params, ATT)
    for o, r in zip(outs, refs):
        assert o.shape == r.shape, (o.shape, r.shape)
        # All matmuls and the softmax normalization are exact f32 now; only
        # order-of-operations (scale folded into Q) differs from the reference.
        assert jnp.allclose(o, r, atol=1e-3, rtol=1e-3), float(jnp.abs(o - r).max())

    print("KERNEL_OK")
</pallas_src>

<mosaic_0001>
module attributes {stable_mosaic.version = 11 : i64} {
  func.func @_cma_kernel(%arg0: i32, %arg1: memref<1x8x16xf32, #tpu.memory_space<vmem>>, %arg2: memref<1x8x32xf32, #tpu.memory_space<vmem>>, %arg3: memref<16x96xf32, #tpu.memory_space<vmem>>, %arg4: memref<1x96xf32, #tpu.memory_space<vmem>>, %arg5: memref<32x96xf32, #tpu.memory_space<vmem>>, %arg6: memref<1x96xf32, #tpu.memory_space<vmem>>, %arg7: memref<1x8x32xf32, #tpu.memory_space<vmem>>, %arg8: memref<1x8x32xf32, #tpu.memory_space<vmem>>, %arg9: memref<1x8x8xf32, #tpu.memory_space<vmem>>, %arg10: memref<1x8x8xf32, #tpu.memory_space<vmem>>) attributes {dimension_semantics = [#tpu.dimension_semantics<parallel>], iteration_bounds = array<i64: 2>, scalar_prefetch = 0 : i64, scratch_operands = 0 : i64, tpu.core_type = #tpu.core_type<tc>, window_params = [{transform_indices = @transform_0, window_bounds = array<i64: 1, 8, 16>}, {transform_indices = @transform_1, window_bounds = array<i64: 1, 8, 32>}, {pipeline_mode = #tpu.pipeline_mode<synchronous>, transform_indices = @transform_2, window_bounds = array<i64: 16, 96>}, {pipeline_mode = #tpu.pipeline_mode<synchronous>, transform_indices = @transform_3, window_bounds = array<i64: 1, 96>}, {pipeline_mode = #tpu.pipeline_mode<synchronous>, transform_indices = @transform_4, window_bounds = array<i64: 32, 96>}, {pipeline_mode = #tpu.pipeline_mode<synchronous>, transform_indices = @transform_5, window_bounds = array<i64: 1, 96>}, {transform_indices = @transform_6, window_bounds = array<i64: 1, 8, 32>}, {transform_indices = @transform_7, window_bounds = array<i64: 1, 8, 32>}, {transform_indices = @transform_8, window_bounds = array<i64: 1, 8, 8>}, {transform_indices = @transform_9, window_bounds = array<i64: 1, 8, 8>}]} {
    %c0 = arith.constant 0 : index
    %c0_0 = arith.constant 0 : index
    %c0_1 = arith.constant 0 : index
    %0 = vector.load %arg1[%c0, %c0_0, %c0_1] : memref<1x8x16xf32, #tpu.memory_space<vmem>>, vector<1x8x16xf32>
    %c0_2 = arith.constant 0 : index
    %c0_3 = arith.constant 0 : index
    %c0_4 = arith.constant 0 : index
    %1 = vector.load %arg2[%c0_2, %c0_3, %c0_4] : memref<1x8x32xf32, #tpu.memory_space<vmem>>, vector<1x8x32xf32>
    %2 = vector.shape_cast %0 : vector<1x8x16xf32> to vector<8x16xf32>
    %c0_5 = arith.constant 0 : index
    %c0_6 = arith.constant 0 : index
    %3 = vector.load %arg3[%c0_5, %c0_6] : memref<16x96xf32, #tpu.memory_space<vmem>>, vector<16x96xf32>
    %cst = arith.constant dense<0.000000e+00> : vector<8x96xf32>
    %4 = tpu.matmul %2, %3, %cst {dimension_numbers = #tpu.dot_dimension_numbers<[1], [0], [0], [1], [0, 0, 1, 1], [], []>} : vector<8x16xf32>, vector<16x96xf32>, vector<8x96xf32> -> vector<8x96xf32>
    %c0_7 = arith.constant 0 : index
    %c0_8 = arith.constant 0 : index
    %5 = vector.load %arg4[%c0_7, %c0_8] : memref<1x96xf32, #tpu.memory_space<vmem>>, vector<1x96xf32>
    %6 = vector.broadcast %5 : vector<1x96xf32> to vector<8x96xf32>
    %7 = arith.addf %4, %6 : vector<8x96xf32>
    %8 = vector.shape_cast %1 : vector<1x8x32xf32> to vector<8x32xf32>
    %c0_9 = arith.constant 0 : index
    %c0_10 = arith.constant 0 : index
    %9 = vector.load %arg5[%c0_9, %c0_10] : memref<32x96xf32, #tpu.memory_space<vmem>>, vector<32x96xf32>
    %cst_11 = arith.constant dense<0.000000e+00> : vector<8x96xf32>
    %10 = tpu.matmul %8, %9, %cst_11 {dimension_numbers = #tpu.dot_dimension_numbers<[1], [0], [0], [1], [0, 0, 1, 1], [], []>} : vector<8x32xf32>, vector<32x96xf32>, vector<8x96xf32> -> vector<8x96xf32>
    %c0_12 = arith.constant 0 : index
    %c0_13 = arith.constant 0 : index
    %11 = vector.load %arg6[%c0_12, %c0_13] : memref<1x96xf32, #tpu.memory_space<vmem>>, vector<1x96xf32>
    %12 = vector.broadcast %11 : vector<1x96xf32> to vector<8x96xf32>
    %13 = arith.addf %10, %12 : vector<8x96xf32>
    %14 = vector.shape_cast %7 : vector<8x96xf32> to vector<1x8x96xf32>
    %15 = vector.shape_cast %13 : vector<8x96xf32> to vector<1x8x96xf32>
    %16 = vector.extract_strided_slice %14 {offsets = [0, 0, 0], sizes = [1, 8, 32], strides = [1, 1, 1]} : vector<1x8x96xf32> to vector<1x8x32xf32>
    %17 = vector.extract_strided_slice %14 {offsets = [0, 0, 32], sizes = [1, 8, 32], strides = [1, 1, 1]} : vector<1x8x96xf32> to vector<1x8x32xf32>
    %18 = vector.extract_strided_slice %14 {offsets = [0, 0, 64], sizes = [1, 8, 32], strides = [1, 1, 1]} : vector<1x8x96xf32> to vector<1x8x32xf32>
    %19 = vector.extract_strided_slice %15 {offsets = [0, 0, 0], sizes = [1, 8, 32], strides = [1, 1, 1]} : vector<1x8x96xf32> to vector<1x8x32xf32>
    %20 = vector.extract_strided_slice %15 {offsets = [0, 0, 32], sizes = [1, 8, 32], strides = [1, 1, 1]} : vector<1x8x96xf32> to vector<1x8x32xf32>
    %21 = vector.extract_strided_slice %15 {offsets = [0, 0, 64], sizes = [1, 8, 32], strides = [1, 1, 1]} : vector<1x8x96xf32> to vector<1x8x32xf32>
    "tpu.trace_start"() <{level = 10 : i32, message = "bqd,bkd->bqk"}> : () -> ()
    %cst_14 = arith.constant dense<0.000000e+00> : vector<1x8x8xf32>
    %22 = tpu.matmul %16, %20, %cst_14 {dimension_numbers = #tpu.dot_dimension_numbers<[2], [2], [1], [1], [0, 0, 0, 1, 1, 1], [0], [0]>} : vector<1x8x32xf32>, vector<1x8x32xf32>, vector<1x8x8xf32> -> vector<1x8x8xf32>
    "tpu.trace_stop"() : () -> ()
    %cst_15 = arith.constant dense<0xFF800000> : vector<1x8xf32>
    %23 = vector.multi_reduction <maximumf>, %22, %cst_15 [2] : vector<1x8x8xf32> to vector<1x8xf32>
    %24 = vector.shape_cast %23 : vector<1x8xf32> to vector<1x8x1xf32>
    %25 = vector.broadcast %24 : vector<1x8x1xf32> to vector<1x8x8xf32>
    %26 = arith.subf %22, %25 : vector<1x8x8xf32>
    %27 = math.exp %26 : vector<1x8x8xf32>
    %cst_16 = arith.constant dense<0.000000e+00> : vector<1x8xf32>
    %28 = vector.multi_reduction <add>, %27, %cst_16 [2] : vector<1x8x8xf32> to vector<1x8xf32>
    %29 = vector.shape_cast %28 : vector<1x8xf32> to vector<1x8x1xf32>
    %30 = vector.broadcast %29 : vector<1x8x1xf32> to vector<1x8x8xf32>
    %31 = arith.divf %27, %30 : vector<1x8x8xf32>
    "tpu.trace_start"() <{level = 10 : i32, message = "bqk,bkd->bqd"}> : () -> ()
    %cst_17 = arith.constant dense<0.000000e+00> : vector<1x8x32xf32>
    %32 = tpu.matmul %31, %21, %cst_17 {dimension_numbers = #tpu.dot_dimension_numbers<[2], [1], [1], [2], [0, 0, 0, 1, 1, 2], [0], [0]>} : vector<1x8x8xf32>, vector<1x8x32xf32>, vector<1x8x32xf32> -> vector<1x8x32xf32>
    "tpu.trace_stop"() : () -> ()
    "tpu.trace_start"() <{level = 10 : i32, message = "bqd,bkd->bqk"}> : () -> ()
    %cst_18 = arith.constant dense<0.000000e+00> : vector<1x8x8xf32>
    %33 = tpu.matmul %19, %17, %cst_18 {dimension_numbers = #tpu.dot_dimension_numbers<[2], [2], [1], [1], [0, 0, 0, 1, 1, 1], [0], [0]>} : vector<1x8x32xf32>, vector<1x8x32xf32>, vector<1x8x8xf32> -> vector<1x8x8xf32>
    "tpu.trace_stop"() : () -> ()
    %cst_19 = arith.constant dense<0xFF800000> : vector<1x8xf32>
    %34 = vector.multi_reduction <maximumf>, %33, %cst_19 [2] : vector<1x8x8xf32> to vector<1x8xf32>
    %35 = vector.shape_cast %34 : vector<1x8xf32> to vector<1x8x1xf32>
    %36 = vector.broadcast %35 : vector<1x8x1xf32> to vector<1x8x8xf32>
    %37 = arith.subf %33, %36 : vector<1x8x8xf32>
    %38 = math.exp %37 : vector<1x8x8xf32>
    %cst_20 = arith.constant dense<0.000000e+00> : vector<1x8xf32>
    %39 = vector.multi_reduction <add>, %38, %cst_20 [2] : vector<1x8x8xf32> to vector<1x8xf32>
    %40 = vector.shape_cast %39 : vector<1x8xf32> to vector<1x8x1xf32>
    %41 = vector.broadcast %40 : vector<1x8x1xf32> to vector<1x8x8xf32>
    %42 = arith.divf %38, %41 : vector<1x8x8xf32>
    "tpu.trace_start"() <{level = 10 : i32, message = "bqk,bkd->bqd"}> : () -> ()
    %cst_21 = arith.constant dense<0.000000e+00> : vector<1x8x32xf32>
    %43 = tpu.matmul %42, %18, %cst_21 {dimension_numbers = #tpu.dot_dimension_numbers<[2], [1], [1], [2], [0, 0, 0, 1, 1, 2], [0], [0]>} : vector<1x8x8xf32>, vector<1x8x32xf32>, vector<1x8x32xf32> -> vector<1x8x32xf32>
    "tpu.trace_stop"() : () -> ()
    %c0_22 = arith.constant 0 : index
    %c0_23 = arith.constant 0 : index
    %c0_24 = arith.constant 0 : index
    %44 = vector.load %arg7[%c0_22, %c0_23, %c0_24] : memref<1x8x32xf32, #tpu.memory_space<vmem>>, vector<1x8x32xf32>
    tpu.vector_store %arg7[%c0_22, %c0_23, %c0_24], %32 {strides = array<i32>} : memref<1x8x32xf32, #tpu.memory_space<vmem>>, vector<1x8x32xf32>,
    %c0_25 = arith.constant 0 : index
    %c0_26 = arith.constant 0 : index
    %c0_27 = arith.constant 0 : index
    %45 = vector.load %arg8[%c0_25, %c0_26, %c0_27] : memref<1x8x32xf32, #tpu.memory_space<vmem>>, vector<1x8x32xf32>
    tpu.vector_store %arg8[%c0_25, %c0_26, %c0_27], %43 {strides = array<i32>} : memref<1x8x32xf32, #tpu.memory_space<vmem>>, vector<1x8x32xf32>,
    %c0_28 = arith.constant 0 : index
    %c0_29 = arith.constant 0 : index
    %c0_30 = arith.constant 0 : index
    %46 = vector.load %arg9[%c0_28, %c0_29, %c0_30] : memref<1x8x8xf32, #tpu.memory_space<vmem>>, vector<1x8x8xf32>
    tpu.vector_store %arg9[%c0_28, %c0_29, %c0_30], %31 {strides = array<i32>} : memref<1x8x8xf32, #tpu.memory_space<vmem>>, vector<1x8x8xf32>,
    %c0_31 = arith.constant 0 : index
    %c0_32 = arith.constant 0 : index
    %c0_33 = arith.constant 0 : index
    %47 = vector.load %arg10[%c0_31, %c0_32, %c0_33] : memref<1x8x8xf32, #tpu.memory_space<vmem>>, vector<1x8x8xf32>
    tpu.vector_store %arg10[%c0_31, %c0_32, %c0_33], %42 {strides = array<i32>} : memref<1x8x8xf32, #tpu.memory_space<vmem>>, vector<1x8x8xf32>,
    return
  }
  func.func @transform_0(%arg0: i32) -> (i32, i32, i32) {
    %c0_i32 = arith.constant 0 : i32
    %c0_i32_0 = arith.constant 0 : i32
    %c0_i32_1 = arith.constant 0 : i32
    return %arg0, %c0_i32, %c0_i32_0 : i32, i32, i32
  }
  func.func @transform_1(%arg0: i32) -> (i32, i32, i32) {
    %c0_i32 = arith.constant 0 : i32
    %c0_i32_0 = arith.constant 0 : i32
    %c0_i32_1 = arith.constant 0 : i32
    return %arg0, %c0_i32, %c0_i32_0 : i32, i32, i32
  }
  func.func @transform_2(%arg0: i32) -> (i32, i32) {
    %c0_i32 = arith.constant 0 : i32
    %c0_i32_0 = arith.constant 0 : i32
    %c0_i32_1 = arith.constant 0 : i32
    return %c0_i32, %c0_i32_0 : i32, i32
  }
  func.func @transform_3(%arg0: i32) -> (i32, i32) {
    %c0_i32 = arith.constant 0 : i32
    %c0_i32_0 = arith.constant 0 : i32
    %c0_i32_1 = arith.constant 0 : i32
    return %c0_i32, %c0_i32_0 : i32, i32
  }
  func.func @transform_4(%arg0: i32) -> (i32, i32) {
    %c0_i32 = arith.constant 0 : i32
    %c0_i32_0 = arith.constant 0 : i32
    %c0_i32_1 = arith.constant 0 : i32
    return %c0_i32, %c0_i32_0 : i32, i32
  }
  func.func @transform_5(%arg0: i32) -> (i32, i32) {
    %c0_i32 = arith.constant 0 : i32
    %c0_i32_0 = arith.constant 0 : i32
    %c0_i32_1 = arith.constant 0 : i32
    return %c0_i32, %c0_i32_0 : i32, i32
  }
  func.func @transform_6(%arg0: i32) -> (i32, i32, i32) {
    %c0_i32 = arith.constant 0 : i32
    %c0_i32_0 = arith.constant 0 : i32
    %c0_i32_1 = arith.constant 0 : i32
    return %arg0, %c0_i32, %c0_i32_0 : i32, i32, i32
  }
  func.func @transform_7(%arg0: i32) -> (i32, i32, i32) {
    %c0_i32 = arith.constant 0 : i32
    %c0_i32_0 = arith.constant 0 : i32
    %c0_i32_1 = arith.constant 0 : i32
    return %arg0, %c0_i32, %c0_i32_0 : i32, i32, i32
  }
  func.func @transform_8(%arg0: i32) -> (i32, i32, i32) {
    %c0_i32 = arith.constant 0 : i32
    %c0_i32_0 = arith.constant 0 : i32
    %c0_i32_1 = arith.constant 0 : i32
    return %arg0, %c0_i32, %c0_i32_0 : i32, i32, i32
  }
  func.func @transform_9(%arg0: i32) -> (i32, i32, i32) {
    %c0_i32 = arith.constant 0 : i32
    %c0_i32_0 = arith.constant 0 : i32
    %c0_i32_1 = arith.constant 0 : i32
    return %arg0, %c0_i32, %c0_i32_0 : i32, i32, i32
  }
}

</mosaic_0001>

<bundles_post_ra>
// kernel: tpu_custom_call.1
= control target key start
LH: loop header
LB: loop body
LE: loop exit
PB: predicated region body
PF: predicated region fallthrough
CT: control target
= control target key end

     0   :  { %s1720_s0 = inlined_call_operand.hbm [shape: f32[2,8,16], index: 0, kind: input, shape index: {}]   ;;  %s1721_s1 = inlined_call_operand.hbm [shape: f32[2,8,32], index: 1, kind: input, shape index: {}]   ;;  %s1722_s2 = inlined_call_operand.hbm [shape: f32[16,96], index: 2, kind: input, shape index: {}]   ;;  %s1723_s3 = inlined_call_operand.vmem [shape: f32[1,96], index: 3, kind: input, shape index: {}]   ;;  %s1724_s4 = inlined_call_operand.hbm [shape: f32[32,96], index: 4, kind: input, shape index: {}]   ;;  %s1725_s5 = inlined_call_operand.vmem [shape: f32[1,96], index: 5, kind: input, shape index: {}]   ;;  %s1726_s6 = inlined_call_operand.hbm [shape: f32[2,8,32], index: 6, kind: output, shape index: {0}]   ;;  %s1727_s7 = inlined_call_operand.hbm [shape: f32[2,8,32], index: 7, kind: output, shape index: {1}]   ;;  %s1728_s8 = inlined_call_operand.hbm [shape: f32[2,8,8], index: 8, kind: output, shape index: {2}]   ;;  %s1729_s9 = inlined_call_operand.hbm [shape: f32[2,8,8], index: 9, kind: output, shape index: {3}]  }
   0x1   :  { %1738 = sst [smem:[#allocation29_spill]] %s1722_s2 }
   0x2   :  { %1739 = sst [smem:[#allocation30_spill]] %s1724_s4 }
   0x3   :  { %15 = vsyncpa [#allocation3], 0 }
   0x4   :  { %17 = vsyncpa [#allocation3 + $0x1], 0 }
   0x5   :  { %18 = vsyncpa [#allocation6], 0 }
   0x6   :  { %20 = vsyncpa [#allocation6 + $0x1], 0 }
   0x7   :  { %21 = vsyncpa [#allocation9], 0 }
   0x8   :  { %22 = vsyncpa [#allocation4], 0 }
   0x9   :  { %24 = vsyncpa [#allocation4 + $0x1], 0 }
   0xa   :  { %25 = vsyncpa [#allocation12], 0 }
   0xb   :  { %27 = vsyncpa [#allocation12 + $0x1], 0 }
   0xc   :  { %28 = vsyncpa [#allocation15], 0 }
   0xd   :  { %30 = vsyncpa [#allocation15 + $0x1], 0  ;;  %s1439_s30 = smov 0   ;;  %s1441_s10 = smov 0  }
   0xe   :  { %s1443_s11 = smov 0   ;;  %s1445_s12 = smov 0  }
   0xf LB: > { %1740 = sst [smem:[#allocation23_spill]] %s1369_s30  ;;  %s1463_s16 = sadd.s32 4294967295, %s1381_s12   ;;  %s1381_s12 = sphi %s1445_s12, %s1759_s12   ;;  %s1377_s11 = sphi %s1443_s11, %s1761_s11   ;;  %s1373_s10 = sphi %s1441_s10, %s1763_s10   ;;  %s1369_s30 = sphi %s1439_s30, %s1762_s30  }
  0x10   : > { %1741 = sst [smem:[#allocation24_spill]] %s1377_s11  ;;  %p955_p0 = scmp.ge.s32.totalorder %s1381_s12, 1 }
  0x11   : > { %1742 = sst [smem:[#allocation25_spill]] %s1381_s12  ;;  %p57_p1 = scmp.eq.s32.totalorder %s1463_s16, 0 }
  0x12   : > { %s1743_s2 = sld [smem:[#allocation29_spill]]  ;;  %p281_p2 = scmp.lt.s32.totalorder %s1381_s12, 3 }
  0x13   : > { %s1383_s18 = smov [#allocation7]   ;;  %s1745_s4 = sld [smem:[#allocation30_spill]] }
  0x14   : > { %p1468_p3 = pnand %p955_p0, %p281_p2  ;;  %s294_s19 = sshll.u32 %s1383_s18, 4  ;;  %s295_s19 = int_to_ptr.vmem [resolvable:$true] %s294_s19 }
  0x15   : > { %s1384_s23 = smov [#allocation8]   ;;  %s1385_s25 = smov 128  }
  0x16   : > { %p1010_p4 = pneg %p1468_p3  ;;  %s311_s24 = sshll.u32 %s1384_s23, 4  ;;  %s312_s24 = int_to_ptr.vmem [resolvable:$true] %s311_s24 }
  0x17   : > { %s1386_s26 = smov 8   ;;  %s1730_s27 = sadd.s32 4294967294, %s1381_s12  }
  0x18   : > { %s292_s15 = sshll.u32 %s1743_s2, 4  ;;  %p1011_p6 = pnand %p1010_p4, %p57_p1  ;;  %s293_s15 = int_to_ptr.hbm [resolvable:$true] %s292_s15 }
  0x19   : > { %s309_s22 = sshll.u32 %s1745_s4, 4  ;;  %s1482_s28 = sadd.s32 1, %s1381_s12   ;;  %s310_s22 = int_to_ptr.hbm [resolvable:$true] %s309_s22 }
  0x1a   : > { %1013 = dma.hbm_to_vmem [thread:$0]  (!%p1011_p6), %s293_s15, 256, %s295_s19, [#allocation6], %s1385_s25, %s1385_s25, %s1386_s26  }
  0x1b   : > { %1016 = dma.hbm_to_vmem [thread:$0]  (!%p1011_p6), %s310_s22, 512, %s312_s24, [#allocation9], %s1385_s25, %s1385_s25, %s1386_s26  }
  0x1c   : > { %1746 = sst [smem:[#allocation26_spill]] %s1482_s28  ;;  %s40_s29 = ssub.s32 %s1381_s12, %s1482_s28 }
  0x1d   : > { %s43_s13 = sadd.s32 1, %s1377_s11  ;;  %p41_p7 = scmp.eq.s32.totalorder %s40_s29, 0 }
  0x1e   : > { %p50_p8 = scmp.ne.s32.totalorder %s1377_s11, %s1373_s10  ;;  %p51_p9 = scmp.eq.s32.totalorder %s1381_s12, 0 }
  0x1f   : > { %p56_p10 = scmp.ne.s32.totalorder %s1373_s10, %s1369_s30  ;;  %p190_p13 = scmp.eq.s32.totalorder %s1463_s16, 1 }
  0x20   : > { %s1493_s14 = scalar_select %p41_p7, %s1377_s11, %s43_s13  }
  0x21   : > { %p1495_p11 = por %p51_p9, %p50_p8  ;;  %p1501_p12 = por %p57_p1, %p56_p10 }
  0x22   : > { %1747 = sst [smem:[#allocation27_spill]] %s1493_s14  ;;  %p196_p0 = scmp.eq.s32.totalorder %s1730_s27, 1 }
  0x23   : > { %p1039_p2 = scmp.lt.s32.totalorder %s1381_s12, 2  ;;  %s328_s19 = sand.u32 1, %s1377_s11  }
  0x24   : > { %p1510_p4 = por %p190_p13, %p50_p8  ;;  %p1514_p6 = por %p196_p0, %p56_p10 }
  0x25   : > { %s1518_s22 = sshll.u32 %s328_s19, 3  ;;  %s960_s23 = sshll.u32 %s1381_s12, 3 }
  0x26   : > { %s1751_s21 = scalar_select %p1514_p6, 1, 0 }
  0x27   : > { %s336_s26 = scalar_lea.hbm %s1720_s0, %s960_s23  ;;  %s332_s29 = scalar_lea.vmem [#allocation2], %s1518_s22 }
  0x28   : > { %1752 = sst [smem:[#allocation28_spill]] %s1751_s21  ;;  %s340_s13 = sshll.u32 %s332_s29, 4  ;;  %s341_s13 = int_to_ptr.vmem [resolvable:$true] %s340_s13 }
  0x29   : > { %s338_s27 = sshll.u32 %s336_s26, 4  ;;  %p1527_p7 = pnand %p1039_p2, %p1495_p11  ;;  %s339_s27 = int_to_ptr.hbm [resolvable:$true] %s338_s27 }
  0x2a   : > { %s355_s11 = scalar_lea.hbm %s1721_s1, %s960_s23  ;;  %s347_s28 = sand.u32 1, %s1381_s12  }
  0x2b   : > { %s329_s21 = scalar_lea.sflag [#allocation3], %s328_s19  ;;  %s1151_s24 = sshra.s32 %s339_s27, 4  ;;  %s1152_s24 = int_to_ptr.hbm [resolvable:$true] %s1151_s24 }
  0x2c   : > { %s1153_s25 = scalar_lea.hbm %s1152_s24, 8  ;;  %p1155_p9 = pneg %p1527_p7 }
  0x2d   : > { %p1154_p8 = scmp.ne.s32.totalorder %s1152_s24, %s1153_s25  ;;  %s1158_s29 = scalar_lea.hbm %s1720_s0, 16 }
  0x2e   : > { %p1159_p13 = scmp.lt.s32.totalorder %s1152_s24, %s1720_s0  ;;  %p1160_p0 = scmp.lt.s32.totalorder %s1158_s29, %s1153_s25 }
  0x2f   : > { %p1156_p10 = pnand %p1155_p9, %p1154_p8 }
  0x30   : > { %p1161_p2 = por %p1160_p0, %p1159_p13 }
  0x31   : > { %p1157_p11 = pneg %p1156_p10 }
  0x33   : > { %p1162_p5 = pnand %p1161_p2, %p1157_p11 }
  0x35   : > { %1165 = shalt.err (!%p1162_p5)
}
  0x36   : > { %1020 = dma.hbm_to_vmem [thread:$0]  (!%p1527_p7), %s339_s27, 128, %s341_s13, %s329_s21  }
  0x37   : > { %s357_s19 = sshll.u32 %s355_s11, 4  ;;  %s351_s23 = scalar_lea.vmem [#allocation5], %s1518_s22  ;;  %s358_s19 = int_to_ptr.hbm [resolvable:$true] %s357_s19 }
  0x38   : > { %s359_s12 = sshll.u32 %s351_s23, 4  ;;  %s348_s18 = scalar_lea.sflag [#allocation6], %s347_s28  ;;  %s360_s12 = int_to_ptr.vmem [resolvable:$true] %s359_s12 }
  0x39   : > { %s1181_s26 = sshra.s32 %s358_s19, 4  ;;  %s1188_s29 = scalar_lea.hbm %s1721_s1, 16  ;;  %s1182_s26 = int_to_ptr.hbm [resolvable:$true] %s1181_s26 }
  0x3a   : > { %s1183_s30 = scalar_lea.hbm %s1182_s26, 8  ;;  %p1189_p5 = scmp.lt.s32.totalorder %s1182_s26, %s1721_s1 }
  0x3b   : > { %p1184_p8 = scmp.ne.s32.totalorder %s1182_s26, %s1183_s30  ;;  %p1190_p13 = scmp.lt.s32.totalorder %s1188_s29, %s1183_s30 }
  0x3d   : > { %p1186_p10 = pnand %p1184_p8, %p1155_p9  ;;  %p1191_p0 = por %p1190_p13, %p1189_p5 }
  0x3f   : > { %p1187_p11 = pneg %p1186_p10 }
  0x41   : > { %p1192_p2 = pnand %p1191_p0, %p1187_p11 }
  0x43   : > { %1195 = shalt.err (!%p1192_p2)
}
  0x44   : > { %1023 = dma.hbm_to_vmem [thread:$0]  (!%p1527_p7), %s358_s19, 128, %s360_s12, %s348_s18  }
  0x45   : > { %368 = sbr.rel (%p1468_p3) target bundleno = 1283 (0x503), region = 44  ;;  %s1563_s11 = sand.u32 (!%p1468_p3), 1, %s1373_s10  }
  0x46   : > { %s1566_s28 = sshll.u32 (!%p1468_p3), %s1563_s11, 3  ;;  %s371_s21 = scalar_lea.sflag (!%p1468_p3), [#allocation3], %s1563_s11 }
  0x47   : > { %s374_s30 = scalar_lea.vmem (!%p1468_p3), [#allocation2], %s1566_s28 }
  0x4a   : > { %1340 = dma.done.wait (%p1501_p12), %s371_s21, 128  }
  0x4b   : > { %1342 = vsyncadd (%p1501_p12), %s371_s21, 4294967168  ;;  %s380_s2 = sand.u32 1, %s1463_s16   ;;  %s384_s17 = scalar_lea.vmem [#allocation5], %s1566_s28 }
  0x4c   : > { %s381_s12 = scalar_lea.sflag [#allocation6], %s380_s2 }
  0x4d   : > { %1344 = dma.done.wait (%p1501_p12), %s381_s12, 128  }
  0x4e   : > { %1346 = vsyncadd (%p1501_p12), %s381_s12, 4294967168 }
  0x4f   : > { %1348 = dma.done.wait (%p57_p1), [#allocation6], 256  }
  0x50   : > { %1350 = vsyncadd (%p57_p1), [#allocation6], 4294967040 }
  0x51   : > { %1352 = dma.done.wait (%p57_p1), [#allocation9], 512  }
  0x52   : > { %1354 = vsyncadd (%p57_p1), [#allocation9], 4294966784  ;;  %v485_v0 = vld [vmem:[#allocation8 + $0x18] sm:$0xff]  ;;  %v484_v1 = vld [vmem:[#allocation8 + $0x10] sm:$0xff]  ;;  %vm458_vm0 = vcmask 130048   ;;  %vm490_vm1 = vcmask 261120  }
  0x53   : > { %506 = vmatpush.msra.mxu1 %v485_v0  ;;  %v483_v2 = vld [vmem:[#allocation8 + $0x8] sm:$0xff]  ;;  %v453_v3 = vld [vmem:[#allocation7 + $0x8] sm:$0xff]  ;;  %v452_v4 = vld [vmem:[#allocation7] sm:$0xff]  ;;  %s1387_s13 = smov 96   ;;  %vm542_vm2 = vcmask 64512   ;;  %s1388_s23 = smov 64  }
  0x54   : > { %476 = vmatpush.msra.mxu0 %v453_v3  ;;  %v450_v5 = vld [vmem:[%s374_s30] sm:$0xff]  ;;  %v482_v6 = vld [vmem:[#allocation8] sm:$0xff]  ;;  %s442_s18 = scalar_lea.vmem [#allocation13], %s1566_s28  ;;  %s428_s26 = scalar_lea.vmem [#allocation10], %s1566_s28 }
  0x55   : > { %507 = vmatpush.msra.mxu1 %v484_v1  ;;  %v451_v7 = vld [vmem:[%s384_s17] sm:$0xff]  ;;  %v1081_v8 = vld [vmem:[%s1725_s5] ss:$0 sm:$0xff]  ;;  %s1617_s24 = sshll.u32 %s1463_s16, 3  ;;  %s449_s25 = scalar_lea.vmem [#allocation14], %s1566_s28 }
  0x56   : > { %477 = vmatpush.msra.mxu0 %v452_v4  ;;  %v1082_v11 = vld [vmem:[%s1723_s3] ss:$0 sm:$0xff]  ;;  %s699_s27 = scalar_lea.hbm %s1726_s6, %s1617_s24  ;;  %s701_s21 = sshll.u32 %s428_s26, 4  ;;  %s702_s21 = int_to_ptr.vmem [resolvable:$true] %s701_s21 }
  0x57   : > { %508 = vmatpush.msra.mxu1 %v483_v2  ;;  %972 = vmatmul.msk.f32.vlgmr.msra.gmra.mxu0 %vm458_vm0, %v450_v5  ;;  %s703_s30 = sshll.u32 %s699_s27, 4  ;;  %s674_s12 = scalar_lea.sflag [#allocation4], %s1563_s11  ;;  %s704_s30 = int_to_ptr.hbm [resolvable:$true] %s703_s30 }
  0x58   : > { %s1225_s17 = sshra.s32 %s704_s30, 4  ;;  %s1231_s14 = scalar_lea.hbm %s1726_s6, 16  ;;  %s1226_s17 = int_to_ptr.hbm [resolvable:$true] %s1225_s17 }
  0x59   : > { %509 = vmatpush.msra.mxu1 %v482_v6  ;;  %s1227_s15 = scalar_lea.hbm %s1226_s17, 8  ;;  %p1232_p7 = scmp.lt.s32.totalorder %s1226_s17, %s1726_s6 }
  0x5a   : > { %973 = vmatmul.msk.f32.vlgmr.msra.gmra.mxu1 %vm490_vm1, %v451_v7  ;;  %p1228_p1 = scmp.ne.s32.totalorder %s1226_s17, %s1227_s15  ;;  %p1233_p9 = scmp.lt.s32.totalorder %s1231_s14, %s1227_s15 }
  0x5c   : > { %p1229_p3 = pnand %p1228_p1, %p1510_p4  ;;  %p1234_p8 = por %p1233_p9, %p1232_p7 }
  0x5e   : > { %p1230_p12 = pneg %p1229_p3 }
  0x60   : > { %p1235_p10 = pnand %p1234_p8, %p1230_p12 }
  0xd4   : > { %v479_v12 = vpop.f32.mrf.mxu0 }
  0xd5   : > { %v480_v13 = vadd.f32 %v1082_v11, %v479_v12 }
  0xd7   : > { %v511_v9 = vpop.f32.mrf.mxu1  ;;  %593 = vrot.lane.b32.xlu2 %v480_v13, %s1387_s13 }
  0xd8   : > { %v512_v10 = vadd.f32 %v1081_v8, %v511_v9 }
  0xda   : > { %515 = vrot.lane.b32.xlu0 %v512_v10, %s1387_s13 }
 0x131   : > { %v594_v35 = vpop.permute.xlu2 %593 }
 0x14c   : > { %v516_v14 = vpop.permute.xlu0 %515 }
 0x14d   : > { %974 = vmatpush.xpose.msk.msra.mxu2 %vm490_vm1, %v516_v14 }
 0x150   : > { %975 = vmatmul.msk.f32.vlgmr.msra.gmra.mxu2 %vm490_vm1, %v480_v13 }
 0x1d3   : > { %v539_v15 = vpop.f32.mrf.mxu2 }
 0x1d4   : > { %v543_v16 = vsel %vm542_vm2, %v539_v15, -inf }
 0x1d5   : > { %544 = vmax.xlane.f32.xlu0 %v543_v16 }
 0x248   : > { %v545_v17 = vpop.xlane.xlu0 %544 }
 0x249   : > { %v546_v18 = vsub.f32 %v539_v15, %v545_v17 }
 0x24b   : > { %v547_v19 = vmul.f32 1.442695, %v546_v18 }
 0x24d   : > { %1083 = vpow2.f32 %v547_v19 }
 0x253   : > { %v1084_v20 = vpop.eup %1083 }
 0x254   : > { %v549_v21 = vsel %vm542_vm2, %v1084_v20, 0.0 }
 0x255   : > { %550 = vadd.xlane.f32.xlu1 %v549_v21 }
 0x26e   : > { %567 = vrot.lane.b32.xlu1 %v512_v10, %s1388_s23 }
 0x2c8   : > { %v551_v22 = vpop.xlane.xlu1 %550 }
 0x2c9   : > { %1085 = vrcp.f32 %v551_v22  ;;  %v563_v26 = vand.u32 2147483648, %v551_v22  ;;  %v561_v28 = vand.u32 2147483647, %v551_v22  ;;  %vm557_vm4 = vweird.f32 %v551_v22 }
 0x2cb   : > { %v564_v30 = vor.u32 1.1754944e-38, %v563_v26  ;;  %vm562_vm6 = vcmp.eq.f32.partialorder %v561_v28, 8.507059e+37 }
 0x2cf   : > { %v1086_v23 = vpop.eup %1085 }
 0x2d0   : > { %v553_v24 = vmul.f32 %v1086_v23, %v551_v22  ;;  %vm558_vm3 = vweird.f32 %v1086_v23 }
 0x2d1   : > { %vm559_vm5 = vmor %vm557_vm4, %vm558_vm3 }
 0x2d2   : > { %v554_v25 = vsub.f32 1.0, %v553_v24 }
 0x2d4   : > { %v555_v27 = vmul.f32 %v1086_v23, %v554_v25 }
 0x2d6   : > { %v556_v29 = vadd.f32 %v1086_v23, %v555_v27 }
 0x2d8   : > { %v560_v31 = vsel %vm559_vm5, %v1086_v23, %v556_v29 }
 0x2d9   : > { %v565_v32 = vsel %vm562_vm6, %v564_v30, %v560_v31 }
 0x2da   : > { %v566_v33 = vmul.f32 %v1084_v20, %v565_v32 }
 0x2dc   : > { %671 = vst.msk [vmem:[%s442_s18] sm:$0xff] %vm542_vm2, %v566_v33 }
 0x2e0   : > { %v568_v34 = vpop.permute.xlu1 %567 }
 0x2e1   : > { %588 = vmatpush.msra.mxu3 %v568_v34 }
 0x2e2   : > { %976 = vmatmul.msk.f32.vlgmr.msra.gmra.mxu3 %vm542_vm2, %v566_v33 }
 0x2e3   : > { %977 = vmatpush.xpose.msk.msrb.mxu3 %vm490_vm1, %v594_v35 }
 0x2ea   : > { %978 = vmatmul.msk.f32.vlgmr.msrb.gmra.mxu3 %vm490_vm1, %v512_v10 }
 0x365   : > { %v590_v36 = vpop.f32.mrf.mxu3 }
 0x366   : > { %669 = vst.msk [vmem:[%s428_s26] sm:$0xff] %vm490_vm1, %v590_v36 }
 0x36d   : > { %v616_v37 = vpop.f32.mrf.mxu3 }
 0x36e   : > { %v619_v38 = vsel %vm542_vm2, %v616_v37, -inf }
 0x36f   : > { %620 = vmax.xlane.f32.xlu2 %v619_v38 }
 0x387   : > { %643 = vrot.lane.b32.xlu2 %v480_v13, %s1388_s23 }
 0x3e2   : > { %v621_v39 = vpop.xlane.xlu2 %620 }
 0x3e3   : > { %v622_v40 = vsub.f32 %v616_v37, %v621_v39 }
 0x3e5   : > { %v623_v41 = vmul.f32 1.442695, %v622_v40 }
 0x3e7   : > { %1087 = vpow2.f32 %v623_v41 }
 0x3ea   : > { %v644_v42 = vpop.permute.xlu2 %643 }
 0x3eb   : > { %664 = vmatpush.msrb.mxu0 %v644_v42 }
 0x3ed   : > { %v1088_v43 = vpop.eup %1087 }
 0x3ee   : > { %v625_v44 = vsel %vm542_vm2, %v1088_v43, 0.0 }
 0x3ef   : > { %626 = vadd.xlane.f32.xlu1 %v625_v44 }
 0x462   : > { %v627_v45 = vpop.xlane.xlu1 %626 }
 0x463   : > { %1089 = vrcp.f32 %v627_v45  ;;  %v639_v49 = vand.u32 2147483648, %v627_v45  ;;  %v637_v51 = vand.u32 2147483647, %v627_v45  ;;  %vm633_vm8 = vweird.f32 %v627_v45 }
 0x465   : > { %v640_v53 = vor.u32 1.1754944e-38, %v639_v49  ;;  %vm638_vm10 = vcmp.eq.f32.partialorder %v637_v51, 8.507059e+37 }
 0x469   : > { %v1090_v46 = vpop.eup %1089 }
 0x46a   : > { %v629_v47 = vmul.f32 %v1090_v46, %v627_v45  ;;  %vm634_vm7 = vweird.f32 %v1090_v46 }
 0x46b   : > { %vm635_vm9 = vmor %vm633_vm8, %vm634_vm7 }
 0x46c   : > { %v630_v48 = vsub.f32 1.0, %v629_v47 }
 0x46e   : > { %v631_v50 = vmul.f32 %v1090_v46, %v630_v48 }
 0x470   : > { %v632_v52 = vadd.f32 %v1090_v46, %v631_v50 }
 0x472   : > { %v636_v54 = vsel %vm635_vm9, %v1090_v46, %v632_v52 }
 0x473   : > { %v641_v55 = vsel %vm638_vm10, %v640_v53, %v636_v54 }
 0x474   : > { %v642_v56 = vmul.f32 %v1088_v43, %v641_v55 }
 0x476   : > { %979 = vmatmul.msk.f32.vlgmr.msrb.gmra.mxu0 %vm542_vm2, %v642_v56  ;;  %672 = vst.msk [vmem:[%s449_s25] sm:$0xff] %vm542_vm2, %v642_v56 }
 0x477   : > { %1238 = shalt.err (!%p1235_p10)
}
 0x478   : > { %1002 = dma.vmem_to_hbm [thread:$0]  (%p1510_p4), %s702_s21, 128, %s704_s30, %s674_s12  }
 0x479   : > { %s741_s4 = scalar_lea.hbm %s1729_s9, %s1617_s24  ;;  %s743_s27 = sshll.u32 %s449_s25, 4  ;;  %s744_s27 = int_to_ptr.vmem [resolvable:$true] %s743_s27 }
 0x47a   : > { %s745_s22 = sshll.u32 %s741_s4, 4  ;;  %s689_s13 = scalar_lea.sflag [#allocation15], %s1563_s11  ;;  %s746_s22 = int_to_ptr.hbm [resolvable:$true] %s745_s22 }
 0x47b   : > { %s1253_s17 = sshra.s32 %s746_s22, 4  ;;  %s1259_s21 = scalar_lea.hbm %s1729_s9, 16  ;;  %s1254_s17 = int_to_ptr.hbm [resolvable:$true] %s1253_s17 }
 0x47c   : > { %s1255_s15 = scalar_lea.hbm %s1254_s17, 8  ;;  %p1260_p0 = scmp.lt.s32.totalorder %s1254_s17, %s1729_s9 }
 0x47d   : > { %p1256_p11 = scmp.ne.s32.totalorder %s1254_s17, %s1255_s15  ;;  %p1261_p2 = scmp.lt.s32.totalorder %s1259_s21, %s1255_s15 }
 0x47f   : > { %p1257_p5 = pnand %p1256_p11, %p1510_p4  ;;  %p1262_p1 = por %p1261_p2, %p1260_p0 }
 0x481   : > { %p1258_p13 = pneg %p1257_p5 }
 0x483   : > { %p1263_p3 = pnand %p1262_p1, %p1258_p13 }
 0x485   : > { %1266 = shalt.err (!%p1263_p3)
}
 0x486   : > { %1005 = dma.vmem_to_hbm [thread:$0]  (%p1510_p4), %s744_s27, 128, %s746_s22, %s689_s13  }
 0x487   : > { %s713_s23 = scalar_lea.hbm %s1727_s7, %s1617_s24  ;;  %s727_s4 = scalar_lea.hbm %s1728_s8, %s1617_s24 }
 0x488   : > { %s435_s17 = scalar_lea.vmem [#allocation11], %s1566_s28  ;;  %s717_s14 = sshll.u32 %s713_s23, 4  ;;  %s718_s14 = int_to_ptr.hbm [resolvable:$true] %s717_s14 }
 0x489   : > { %s715_s15 = sshll.u32 %s435_s17, 4  ;;  %s1665_s19 = sshll.u32 %s442_s18, 4  ;;  %s716_s15 = int_to_ptr.vmem [resolvable:$true] %s715_s15  ;;  %s730_s19 = int_to_ptr.vmem [resolvable:$true] %s1665_s19 }
 0x48a   : > { %s1667_s21 = sshll.u32 %s727_s4, 4  ;;  %s679_s24 = scalar_lea.sflag [#allocation12], %s380_s2  ;;  %s732_s21 = int_to_ptr.hbm [resolvable:$true] %s1667_s21 }
 0x48b   : > { %s1281_s27 = sshra.s32 %s718_s14, 4  ;;  %s1287_s13 = scalar_lea.hbm %s1727_s7, 16  ;;  %s1282_s27 = int_to_ptr.hbm [resolvable:$true] %s1281_s27 }
 0x48c   : > { %s1283_s22 = scalar_lea.hbm %s1282_s27, 8  ;;  %p1288_p8 = scmp.lt.s32.totalorder %s1282_s27, %s1727_s7 }
 0x48d   : > { %p1284_p12 = scmp.ne.s32.totalorder %s1282_s27, %s1283_s22  ;;  %p1289_p10 = scmp.lt.s32.totalorder %s1287_s13, %s1283_s22 }
 0x48f   : > { %p1285_p7 = pnand %p1284_p12, %p1510_p4  ;;  %p1290_p11 = por %p1289_p10, %p1288_p8 }
 0x491   : > { %p1286_p9 = pneg %p1285_p7 }
 0x493   : > { %p1291_p5 = pnand %p1290_p11, %p1286_p9 }
 0x4f3   : > { %v666_v57 = vpop.f32.mrf.mxu0 }
 0x4f4   : > { %670 = vst.msk [vmem:[%s435_s17] sm:$0xff] %vm490_vm1, %v666_v57 }
 0x4f5   : > { %1294 = shalt.err (!%p1291_p5)
}
 0x4f6   : > { %1003 = dma.vmem_to_hbm [thread:$0]  (%p1510_p4), %s716_s15, 128, %s718_s14, %s679_s24  }
 0x4f7   : > { %s1309_s16 = sshra.s32 %s732_s21, 4  ;;  %s1315_s23 = scalar_lea.hbm %s1728_s8, 16  ;;  %s1310_s16 = int_to_ptr.hbm [resolvable:$true] %s1309_s16 }
 0x4f8   : > { %s1311_s2 = scalar_lea.hbm %s1310_s16, 8  ;;  %p1316_p1 = scmp.lt.s32.totalorder %s1310_s16, %s1728_s8 }
 0x4f9   : > { %p1312_p13 = scmp.ne.s32.totalorder %s1310_s16, %s1311_s2  ;;  %p1317_p3 = scmp.lt.s32.totalorder %s1315_s23, %s1311_s2 }
 0x4fb   : > { %p1313_p0 = pnand %p1312_p13, %p1510_p4  ;;  %p1318_p12 = por %p1317_p3, %p1316_p1 }
 0x4fd   : > { %p1314_p2 = pneg %p1313_p0 }
 0x4ff   : > { %p1319_p7 = pnand %p1318_p12, %p1314_p2 }
 0x501   : > { %1322 = shalt.err (!%p1319_p7)
}
 0x502   : > { %1004 = dma.vmem_to_hbm [thread:$0]  (%p1510_p4), %s730_s19, 128, %s732_s21, %s679_s24  }
 0x503 PF: > { %s1754_s4 = sld [smem:[#allocation23_spill]] }
 0x504   : > { %s1756_s15 = sld [smem:[#allocation25_spill]] }
 0x509   : > { %s757_s14 = sand.u32 1, %s1754_s4  }
 0x50a   : > { %p1757_p9 = scmp.ge.s32.totalorder %s1756_s15, 2  ;;  %s758_s27 = scalar_lea.sflag [#allocation4], %s757_s14 }
 0x50c   : > { %p1025_p8 = pnand %p1757_p9, %p1514_p6 }
 0x50e   : > { %p1026_p10 = pneg %p1025_p8 }
 0x510   : > { %1356 = dma.done.wait (%p1026_p10), %s758_s27, 128  }
 0x511   : > { %1358 = vsyncadd (%p1026_p10), %s758_s27, 4294967168  ;;  %s1758_s22 = sadd.s32 4294967294, %s1756_s15  }
 0x512   : > { %s767_s20 = sand.u32 1, %s1758_s22  }
 0x513   : > { %s768_s28 = scalar_lea.sflag [#allocation12], %s767_s20 }
 0x514   : > { %1360 = dma.done.wait (%p1026_p10), %s768_s28, 256  }
 0x515   : > { %1362 = vsyncadd (%p1026_p10), %s768_s28, 4294967040  ;;  %s788_s18 = scalar_lea.sflag [#allocation15], %s757_s14 }
 0x516   : > { %1364 = dma.done.wait (%p1026_p10), %s788_s18, 128  }
 0x517   : > { %1366 = vsyncadd (%p1026_p10), %s788_s18, 4294967168  ;;  %s1759_s12 = sld [smem:[#allocation26_spill]]  ;;  %s1762_s30 = smov %s1373_s10 }
 0x518   : > { %s1760_s19 = sld [smem:[#allocation24_spill]] }
 0x519   : > { %s1761_s11 = sld [smem:[#allocation27_spill]] }
 0x51d   : > { %p33_p4 = scmp.ge.s32.totalorder %s1759_s12, 4  }
 0x51e   : > { %s1763_s10 = smov %s1760_s19 }
 0x51f   :  { %35 = sbr.rel (!%p33_p4) target bundleno = 15 (0xf), region = 159 }
 0x524   :  { %794 = vsyncpa [#allocation3], 1 }
 0x525   :  { %796 = vsyncpa [#allocation3 + $0x1], 1 }
 0x526   :  { %797 = vsyncpa [#allocation6], 1 }
 0x527   :  { %799 = vsyncpa [#allocation6 + $0x1], 1 }
 0x528   :  { %800 = vsyncpa [#allocation9], 1 }
 0x529   :  { %801 = vsyncpa [#allocation4], 1 }
 0x52a   :  { %803 = vsyncpa [#allocation4 + $0x1], 1 }
 0x52b   :  { %804 = vsyncpa [#allocation12], 1 }
 0x52c   :  { %806 = vsyncpa [#allocation12 + $0x1], 1 }
 0x52d   :  { %807 = vsyncpa [#allocation15], 1 }
 0x52e   :  { %809 = vsyncpa [#allocation15 + $0x1], 1 }

</bundles_post_ra>
